<compile_context>
chip_gen: v7x
topology: tpu7x:2x2x1
jax: 0.10.0
libtpu: 0.0.40
codegen_flags: <defaults>
</compile_context>

<pallas_src>
import functools

import jax
import jax.numpy as jnp
from jax.experimental import pallas as pl
from jax.experimental.pallas import tpu as pltpu


def _round_up(v, m):
    return ((v + m - 1) // m) * m


def _vmem_budgets():
    """Generation-aware VMEM sizing (v5e/v6e: 128 MiB, v7x: 64 MiB)."""
    try:
        cap = int(pltpu.get_tpu_info().vmem_capacity_bytes)
    except Exception:
        cap = 64 * 1024 * 1024          # conservative default (v7x-sized)
    big_buf_budget = (cap * 3) // 4     # budget the tiles are planned against
    vmem_limit = (cap * 7) // 8         # scoped limit handed to Mosaic
    return big_buf_budget, vmem_limit


# ----------------------------------------------------------------------------
# Single-pass kernel: each block holds the full batch for a strip of columns.
# ----------------------------------------------------------------------------
def _batchnorm_kernel(x_ref, gamma_ref, beta_ref, out_ref, *, eps, inv_b):
    xf = x_ref[...].astype(jnp.float32)                       # (B, TN)

    # Two-pass column statistics (x is resident in VMEM, so this is ~free and
    # avoids E[x^2]-mean^2 cancellation). Sublane reductions go to the XLU.
    mean = jnp.sum(xf, axis=0, keepdims=True) * inv_b          # (1, TN)
    d = xf - mean                                              # (B, TN)
    var = jnp.sum(d * d, axis=0, keepdims=True) * inv_b        # (1, TN), biased

    inv_std = jax.lax.rsqrt(var + eps)                         # (1, TN), EUP
    scale = gamma_ref[...].astype(jnp.float32) * inv_std       # (1, TN)
    beta = beta_ref[...].astype(jnp.float32)                   # (1, TN)

    # y = (x - mean) * (gamma * inv_std) + beta  — one mul + one add on (B,TN)
    out_ref[...] = (d * scale + beta).astype(out_ref.dtype)


# ----------------------------------------------------------------------------
# Fallback (huge n_batch): sweep 1 — per-column sums with batch tiling.
# ----------------------------------------------------------------------------
def _stats_kernel(x_ref, s1_ref, s2_ref, s1_acc, s2_acc, *, n_batch, tb):
    b = pl.program_id(1)

    @pl.when(b == 0)
    def _():
        s1_acc[...] = jnp.zeros_like(s1_acc)
        s2_acc[...] = jnp.zeros_like(s2_acc)

    xf = x_ref[...].astype(jnp.float32)                        # (TB, TN)
    # Mask ragged rows of the last batch tile so they don't pollute the sums.
    row = jax.lax.broadcasted_iota(jnp.int32, xf.shape, 0) + b * tb
    xf = jnp.where(row < n_batch, xf, 0.0)

    s1_acc[...] += jnp.sum(xf, axis=0, keepdims=True)
    s2_acc[...] += jnp.sum(xf * xf, axis=0, keepdims=True)

    @pl.when(b == pl.num_programs(1) - 1)
    def _():
        s1_ref[...] = s1_acc[...]
        s2_ref[...] = s2_acc[...]


# ----------------------------------------------------------------------------
# Fallback: sweep 2 — fused per-column scale/shift.
# ----------------------------------------------------------------------------
def _apply_kernel(x_ref, scale_ref, shift_ref, out_ref):
    xf = x_ref[...].astype(jnp.float32)
    out_ref[...] = (xf * scale_ref[...] + shift_ref[...]).astype(out_ref.dtype)


def custom_batchnorm_forward(x, gamma, beta, eps=1e-5):
    """Equivalent of CustomBatchNormManualFunction.forward.

    Args:
      x:     (n_batch, n_neurons) float
      gamma: (n_neurons,) float
      beta:  (n_neurons,) float
      eps:   small float added to the variance
    Returns:
      (n_batch, n_neurons) batch-normalized tensor (same dtype as x).
    """
    n_batch, n_neurons = x.shape
    assert gamma.shape == (n_neurons,) and beta.shape == (n_neurons,)

    itemsize = jnp.dtype(x.dtype).itemsize
    inv_b = 1.0 / float(n_batch)
    eps = float(eps)

    big_buf_budget, vmem_limit = _vmem_budgets()
    n_pad128 = _round_up(n_neurons, 128)

    gamma2d = gamma.reshape(1, n_neurons)
    beta2d = beta.reshape(1, n_neurons)

    # Per-lane VMEM bytes of the single-pass path: double-buffered input and
    # output tiles (native dtype) plus ~3 full-tile f32 temporaries
    # (upcast copy, centered copy, pre-cast result).
    per_lane_bytes = n_batch * (4 * itemsize + 12)
    max_tn = (big_buf_budget // per_lane_bytes) // 128 * 128

    if max_tn >= 128:
        # ------------------------- single-pass path --------------------------
        tn = min(n_pad128, max_tn)
        # v7x has 2 TensorCores sharing HBM: make sure the (bandwidth-bound)
        # grid has at least 2 "parallel" steps when the width allows it.
        if tn >= n_pad128 and n_pad128 >= 256:
            tn = _round_up(n_pad128 // 2, 128)
        num_tiles = pl.cdiv(n_neurons, tn)

        kernel = functools.partial(_batchnorm_kernel, eps=eps, inv_b=inv_b)
        cost = pl.CostEstimate(
            flops=6 * n_batch * n_neurons,
            transcendentals=n_neurons,
            bytes_accessed=2 * n_batch * n_neurons * itemsize + 3 * n_neurons * 4,
        )

        return pl.pallas_call(
            kernel,
            out_shape=jax.ShapeDtypeStruct((n_batch, n_neurons), x.dtype),
            grid_spec=pl.GridSpec(
                grid=(num_tiles,),
                in_specs=[
                    pl.BlockSpec((n_batch, tn), lambda j: (0, j)),
                    pl.BlockSpec((1, tn), lambda j: (0, j)),
                    pl.BlockSpec((1, tn), lambda j: (0, j)),
                ],
                out_specs=pl.BlockSpec((n_batch, tn), lambda j: (0, j)),
            ),
            compiler_params=pltpu.CompilerParams(
                dimension_semantics=("parallel",),
                vmem_limit_bytes=vmem_limit,
            ),
            cost_estimate=cost,
        )(x, gamma2d, beta2d)

    # ----------------- fallback: batch-tiled two-sweep path -------------------
    # n_batch is so large that even a (n_batch, 128) strip exceeds the VMEM
    # budget.  Sweep 1 accumulates per-column sums over batch tiles; sweep 2
    # applies the fused scale/shift.  x is read twice from HBM (unavoidable).
    tn = min(n_pad128, 512)
    per_row_bytes = tn * (4 * itemsize + 8)
    tb = (big_buf_budget // per_row_bytes) // 8 * 8
    tb = max(8, min(tb, _round_up(n_batch, 8)))
    num_lane_tiles = pl.cdiv(n_neurons, tn)
    num_batch_tiles = pl.cdiv(n_batch, tb)

    stats = functools.partial(_stats_kernel, n_batch=n_batch, tb=tb)
    s1, s2 = pl.pallas_call(
        stats,
        out_shape=(
            jax.ShapeDtypeStruct((1, n_neurons), jnp.float32),
            jax.ShapeDtypeStruct((1, n_neurons), jnp.float32),
        ),
        grid_spec=pltpu.PrefetchScalarGridSpec(
            num_scalar_prefetch=0,
            grid=(num_lane_tiles, num_batch_tiles),
            in_specs=[pl.BlockSpec((tb, tn), lambda j, b: (b, j))],
            out_specs=(
                pl.BlockSpec((1, tn), lambda j, b: (0, j)),
                pl.BlockSpec((1, tn), lambda j, b: (0, j)),
            ),
            scratch_shapes=[
                pltpu.VMEM((1, tn), jnp.float32),
                pltpu.VMEM((1, tn), jnp.float32),
            ],
        ),
        compiler_params=pltpu.CompilerParams(
            dimension_semantics=("parallel", "arbitrary"),
            vmem_limit_bytes=vmem_limit,
        ),
    )(x)

    # Tiny (1, n_neurons) arithmetic in plain XLA.
    # TODO(synk): the fallback uses one-pass E[x^2]-mean^2 with f32 accumulators
    # (clamped at 0); a fully two-pass variance would need a third batch sweep.
    mean = s1 * inv_b
    var = jnp.maximum(s2 * inv_b - mean * mean, 0.0)
    inv_std = jax.lax.rsqrt(var + eps)
    scale = gamma2d.astype(jnp.float32) * inv_std
    shift = beta2d.astype(jnp.float32) - mean * scale

    return pl.pallas_call(
        _apply_kernel,
        out_shape=jax.ShapeDtypeStruct((n_batch, n_neurons), x.dtype),
        grid_spec=pl.GridSpec(
            grid=(num_lane_tiles, num_batch_tiles),
            in_specs=[
                pl.BlockSpec((tb, tn), lambda j, b: (b, j)),
                pl.BlockSpec((1, tn), lambda j, b: (0, j)),
                pl.BlockSpec((1, tn), lambda j, b: (0, j)),
            ],
            out_specs=pl.BlockSpec((tb, tn), lambda j, b: (b, j)),
        ),
        compiler_params=pltpu.CompilerParams(
            dimension_semantics=("parallel", "parallel"),
            vmem_limit_bytes=vmem_limit,
        ),
    )(x, scale, shift)


class CustomBatchNormManualModule:
    """JAX/Pallas equivalent of the PyTorch CustomBatchNormManualModule.

    Only the forward pass is implemented.
    """

    def __init__(self, n_neurons, eps=1e-5):
        self.n_neurons = n_neurons
        self.eps = eps
        # deterministic init, matching torch.ones / torch.zeros
        self.gamma = jnp.ones((n_neurons,), dtype=jnp.float32)
        self.beta = jnp.zeros((n_neurons,), dtype=jnp.float32)

    def __call__(self, x):
        if x.shape[1] == self.n_neurons:
            return custom_batchnorm_forward(x, self.gamma, self.beta, self.eps)
        else:
            print("Incorrect shape")
            return None


if __name__ == "__main__":
    key = jax.random.PRNGKey(0)
    n_batch, n_neurons = 8, 32
    x = jax.random.normal(key, (n_batch, n_neurons), dtype=jnp.float32) * 2.0 + 0.5

    module = CustomBatchNormManualModule(n_neurons)
    out = module(x)
    out = jax.block_until_ready(out)

    # reference check in plain JAX
    mean = x.mean(axis=0)
    var = x.var(axis=0)  # biased, matches unbiased=False
    ref = (x - mean[None, :]) / jnp.sqrt(var + 1e-5)[None, :]
    ref = ref * module.gamma[None, :] + module.beta[None, :]

    assert out.shape == (n_batch, n_neurons)
    assert jnp.allclose(out, ref, atol=1e-5, rtol=1e-5)

    print("KERNEL_OK")
</pallas_src>

<mosaic_0001>
module attributes {stable_mosaic.version = 11 : i64} {
  func.func @_batchnorm_kernel(%arg0: i32, %arg1: memref<8x128xf32, #tpu.memory_space<vmem>>, %arg2: memref<1x128xf32, #tpu.memory_space<vmem>>, %arg3: memref<1x128xf32, #tpu.memory_space<vmem>>, %arg4: memref<8x128xf32, #tpu.memory_space<vmem>>) attributes {dimension_semantics = [#tpu.dimension_semantics<parallel>], iteration_bounds = array<i64: 1>, scalar_prefetch = 0 : i64, scratch_operands = 0 : i64, tpu.core_type = #tpu.core_type<tc>, window_params = [{transform_indices = @transform_0, window_bounds = array<i64: 8, 128>}, {transform_indices = @transform_1, window_bounds = array<i64: 1, 128>}, {transform_indices = @transform_2, window_bounds = array<i64: 1, 128>}, {transform_indices = @transform_3, window_bounds = array<i64: 8, 128>}]} {
    %c0 = arith.constant 0 : index
    %c0_0 = arith.constant 0 : index
    %0 = vector.load %arg1[%c0, %c0_0] : memref<8x128xf32, #tpu.memory_space<vmem>>, vector<8x128xf32>
    %cst = arith.constant dense<0.000000e+00> : vector<128xf32>
    %1 = vector.multi_reduction <add>, %0, %cst [0] : vector<8x128xf32> to vector<128xf32>
    %2 = vector.shape_cast %1 : vector<128xf32> to vector<1x128xf32>
    %cst_1 = arith.constant 1.250000e-01 : f32
    %3 = vector.broadcast %cst_1 : f32 to vector<1x128xf32>
    %4 = arith.mulf %2, %3 : vector<1x128xf32>
    %5 = vector.broadcast %4 : vector<1x128xf32> to vector<8x128xf32>
    %6 = arith.subf %0, %5 : vector<8x128xf32>
    %7 = arith.mulf %6, %6 : vector<8x128xf32>
    %cst_2 = arith.constant dense<0.000000e+00> : vector<128xf32>
    %8 = vector.multi_reduction <add>, %7, %cst_2 [0] : vector<8x128xf32> to vector<128xf32>
    %9 = vector.shape_cast %8 : vector<128xf32> to vector<1x128xf32>
    %cst_3 = arith.constant 1.250000e-01 : f32
    %10 = vector.broadcast %cst_3 : f32 to vector<1x128xf32>
    %11 = arith.mulf %9, %10 : vector<1x128xf32>
    %cst_4 = arith.constant 9.99999974E-6 : f32
    %12 = vector.broadcast %cst_4 : f32 to vector<1x128xf32>
    %13 = arith.addf %11, %12 : vector<1x128xf32>
    %14 = math.rsqrt %13 : vector<1x128xf32>
    %c0_5 = arith.constant 0 : index
    %c0_6 = arith.constant 0 : index
    %15 = vector.load %arg2[%c0_5, %c0_6] : memref<1x128xf32, #tpu.memory_space<vmem>>, vector<1x128xf32>
    %16 = arith.mulf %15, %14 : vector<1x128xf32>
    %c0_7 = arith.constant 0 : index
    %c0_8 = arith.constant 0 : index
    %17 = vector.load %arg3[%c0_7, %c0_8] : memref<1x128xf32, #tpu.memory_space<vmem>>, vector<1x128xf32>
    %18 = vector.broadcast %16 : vector<1x128xf32> to vector<8x128xf32>
    %19 = arith.mulf %6, %18 : vector<8x128xf32>
    %20 = vector.broadcast %17 : vector<1x128xf32> to vector<8x128xf32>
    %21 = arith.addf %19, %20 : vector<8x128xf32>
    %c0_9 = arith.constant 0 : index
    %c0_10 = arith.constant 0 : index
    %22 = vector.load %arg4[%c0_9, %c0_10] : memref<8x128xf32, #tpu.memory_space<vmem>>, vector<8x128xf32>
    tpu.vector_store %arg4[%c0_9, %c0_10], %21 {strides = array<i32>} : memref<8x128xf32, #tpu.memory_space<vmem>>, vector<8x128xf32>,
    return
  }
  func.func @transform_0(%arg0: i32) -> (i32, i32) {
    %c0_i32 = arith.constant 0 : i32
    %c0_i32_0 = arith.constant 0 : i32
    return %c0_i32, %arg0 : i32, i32
  }
  func.func @transform_1(%arg0: i32) -> (i32, i32) {
    %c0_i32 = arith.constant 0 : i32
    %c0_i32_0 = arith.constant 0 : i32
    return %c0_i32, %arg0 : i32, i32
  }
  func.func @transform_2(%arg0: i32) -> (i32, i32) {
    %c0_i32 = arith.constant 0 : i32
    %c0_i32_0 = arith.constant 0 : i32
    return %c0_i32, %arg0 : i32, i32
  }
  func.func @transform_3(%arg0: i32) -> (i32, i32) {
    %c0_i32 = arith.constant 0 : i32
    %c0_i32_0 = arith.constant 0 : i32
    return %c0_i32, %arg0 : i32, i32
  }
}

</mosaic_0001>

<bundles_post_ra>
// kernel: tpu_custom_call.1
= control target key start
LH: loop header
LB: loop body
LE: loop exit
PB: predicated region body
PF: predicated region fallthrough
CT: control target
= control target key end

     0   :  { %8 = vsyncpa [#allocation3], 0  ;;  %s184_s0 = inlined_call_operand.hbm [shape: f32[8,32], index: 0, kind: input, shape index: {}]   ;;  %s185_s1 = inlined_call_operand.vmem [shape: f32[1,32], index: 1, kind: input, shape index: {}]   ;;  %s186_s2 = inlined_call_operand.vmem [shape: f32[1,32], index: 2, kind: input, shape index: {}]   ;;  %s187_s3 = inlined_call_operand.hbm [shape: f32[8,32], index: 3, kind: output, shape index: {}]  }
   0x1   :  { %9 = vsyncpa [#allocation4], 0  ;;  %s132_s12 = smov [#allocation2]   ;;  %s84_s16 = scalar_lea.hbm %s184_s0, 128 }
   0x2   :  { %s16_s13 = sshll.u32 %s132_s12, 4  ;;  %p85_p0 = scmp.ne.s32.totalorder %s184_s0, %s84_s16  ;;  %s17_s13 = int_to_ptr.vmem [resolvable:$true] %s16_s13 }
   0x3   :  { %p88_p1 = scmp.lt.u32.totalorder %s84_s16, %s184_s0 }
   0x5   :  { %p90_p2 = pnand %p88_p1, %p85_p0 }
   0x7   :  { %93 = shalt.err (!%p90_p2)
}
   0x8   :  { %s94_s21 = scalar_lea.vmem %s17_s13, 128  ;;  %p99_p4 = scmp.lt.s32.totalorder %s17_s13, %s17_s13 }
   0x9   :  { %p95_p3 = scmp.ne.s32.totalorder %s17_s13, %s94_s21  ;;  %p100_p5 = scmp.lt.s32.totalorder %s94_s21, %s94_s21 }
   0xb   :  { %p101_p6 = por %p100_p5, %p99_p4 }
   0xd   :  { %p102_p7 = pnand %p101_p6, %p95_p3 }
   0xf   :  { %105 = shalt.err (!%p102_p7)
}
  0x10   :  { %19 = dma.hbm_to_vmem [thread:$0]  %s184_s0, 128, %s17_s13, [#allocation3]  }
  0x11   :  { %128 = dma.done.wait [#allocation3], 128  }
  0x12   :  { %129 = vsyncadd [#allocation3], 4294967168  ;;  %v27_v0 = vld [vmem:[#allocation2] sm:$0xff]  ;;  %v50_v18 = vlaneseq  ;;  %s133_s27 = smov [#allocation5]  }
  0x13   :  { %v28_v1 = vrot.slane %v27_v0, 4  ;;  %v46_v20 = vld [vmem:[%s185_s1] sm:$0x1]  ;;  %s70_s28 = sshll.u32 %s133_s27, 4  ;;  %s71_s28 = int_to_ptr.vmem [resolvable:$true] %s70_s28 }
  0x14   :  { %v51_v19 = vshrl.u32 %v50_v18, 7  ;;  %v79_v25 = vld [vmem:[%s186_s2] ss:$0 sm:$0xff]  ;;  %s106_s29 = scalar_lea.vmem %s71_s28, 128  ;;  %p111_p9 = scmp.lt.s32.totalorder %s71_s28, %s71_s28 }
  0x15   :  { %v29_v2 = vadd.f32 %v28_v1, %v27_v0  ;;  %p107_p8 = scmp.ne.s32.totalorder %s71_s28, %s106_s29  ;;  %p112_p10 = scmp.lt.s32.totalorder %s106_s29, %s106_s29 }
  0x16   :  { %v52_v21 = vsub.s32 0, %v51_v19 }
  0x17   :  { %v30_v3 = vrot.slane %v29_v2, 2  ;;  %p113_p11 = por %p112_p10, %p111_p9 }
  0x19   :  { %v31_v4 = vadd.f32 %v30_v3, %v29_v2  ;;  %p114_p12 = pnand %p113_p11, %p107_p8 }
  0x1b   :  { %v32_v5 = vrot.slane %v31_v4, 1 }
  0x1d   :  { %v33_v6 = vadd.f32 %v32_v5, %v31_v4 }
  0x1f   :  { %v34_v7 = vmul.f32 0.125, %v33_v6 }
  0x21   :  { %v35_v8 = vsub.f32 %v27_v0, %v34_v7 }
  0x23   :  { %v36_v9 = vmul.f32 %v35_v8, %v35_v8 }
  0x25   :  { %v37_v10 = vrot.slane %v36_v9, 4 }
  0x27   :  { %v38_v11 = vadd.f32 %v37_v10, %v36_v9 }
  0x29   :  { %v39_v12 = vrot.slane %v38_v11, 2 }
  0x2b   :  { %v40_v13 = vadd.f32 %v39_v12, %v38_v11 }
  0x2d   :  { %v41_v14 = vrot.slane %v40_v13, 1 }
  0x2f   :  { %v42_v15 = vadd.f32 %v41_v14, %v40_v13 }
  0x31   :  { %v43_v16 = vmul.f32 0.125, %v42_v15 }
  0x33   :  { %v44_v17 = vadd.f32 1e-05, %v43_v16 }
  0x35   :  { %82 = vrsqrt.f32 %v44_v17 }
  0x3f   :  { %v83_v22 = vpop.eup %82 }
  0x40   :  { %v47_v23 = vmul.f32 %v83_v22, %v46_v20 }
  0x42   :  { %v53_v24 = vrot.slane %v47_v23, %v52_v21 }
  0x44   :  { %v55_v26 = vmul.f32 %v53_v24, %v35_v8 }
  0x46   :  { %v62_v27 = vadd.f32 %v79_v25, %v55_v26 }
  0x48   :  { %63 = vst [vmem:[#allocation5] sm:$0xff] %v62_v27 }
  0x49   :  { %117 = shalt.err (!%p114_p12)
}
  0x4a   :  { %s118_s4 = scalar_lea.hbm %s187_s3, 128 }
  0x4b   :  { %p119_p13 = scmp.ne.s32.totalorder %s187_s3, %s118_s4  ;;  %p122_p0 = scmp.lt.u32.totalorder %s118_s4, %s187_s3 }
  0x4d   :  { %p124_p1 = pnand %p122_p0, %p119_p13 }
  0x4f   :  { %127 = shalt.err (!%p124_p1)
}
  0x50   :  { %73 = dma.vmem_to_hbm [thread:$0]  %s71_s28, 128, %s187_s3, [#allocation4]  }
  0x51   :  { %130 = dma.done.wait [#allocation4], 128  }
  0x52   :  { %131 = vsyncadd [#allocation4], 4294967168 }
  0x53   :  { %77 = vsyncpa [#allocation3], 1 }
  0x54   :  { %78 = vsyncpa [#allocation4], 1 }

</bundles_post_ra>
